<compile_context>
chip_gen: v7x
topology: tpu7x:2x2x1
jax: 0.10.0
libtpu: 0.0.40
codegen_flags: <defaults>
</compile_context>

<pallas_src>
import functools

import jax
import jax.numpy as jnp
from jax.experimental import pallas as pl
from jax.experimental.pallas import tpu as pltpu

MAX_LEN = 5000
_VMEM_LIMIT_BYTES = 48 << 20  # <= 64 MiB physical on v7x; far below 128 MiB on v5e/v6e.


def make_pe_buffer(d_model: int, max_len: int = MAX_LEN) -> jnp.ndarray:
    """Exact replica of the module's (non-standard) buffer init, shape (max_len, d_model), fp32.

    div_term = 1 / 10000 ** (2 * arange(d_model) / d_model)
    pe[:, 0::2] = sin(position * div_term[0::2]); pe[:, 1::2] = cos(position * div_term[1::2])
    Built ONCE at module init and kept fp32 (like the torch buffer); no per-call slice/cast.
    """
    position = jnp.arange(max_len, dtype=jnp.float32)[:, None]                  # (max_len, 1)
    div_term = 1.0 / (10000.0 ** (2.0 * jnp.arange(d_model, dtype=jnp.float32) / d_model))
    pe = jnp.zeros((max_len, d_model), dtype=jnp.float32)
    pe = pe.at[:, 0::2].set(jnp.sin(position * div_term[0::2]))
    pe = pe.at[:, 1::2].set(jnp.cos(position * div_term[1::2]))
    return pe


def _pe_add_kernel(x_ref, pe_ref, o_ref, *, batch: int, d_model: int):
    # x_ref / o_ref: (ts, batch * d_model) lane-dense blocks; pe_ref: (ts, d_model).
    # Broadcast pe across the batch with STATIC lane slices (period d_model along lanes):
    # this avoids any in-kernel reshape/relayout and lowers for every (B, D).  The kernel
    # is HBM-bound, so the extra VPU slice work is free.
    # Add in fp32 (the pe buffer is fp32, matching torch's promotion of the add) and cast
    # at the store.  Output keeps x.dtype (the module's callers expect x-shaped/typed out).
    # TODO(synk): generate pe in-kernel from div_term (EUP sin/cos) to drop even the 1/B
    # pe read traffic once sin/cos lowering is guaranteed portable across chips.
    pe = pe_ref[...].astype(jnp.float32)
    for b in range(batch):  # static unroll; batch is small for (S, B, D) transformer inputs
        sl = slice(b * d_model, (b + 1) * d_model)
        o_ref[:, sl] = (x_ref[:, sl].astype(jnp.float32) + pe).astype(o_ref.dtype)


def _num_tensorcores() -> int:
    """Best-effort TensorCore count (2 on v7x, 1 on v5e/v6e).  Defaults to 1 if unknown."""
    try:
        info = pltpu.get_tpu_info()
        for attr in ("num_cores", "core_count", "num_tensorcores", "tensorcore_count"):
            v = getattr(info, attr, None)
            if isinstance(v, int) and v > 0:
                return v
    except Exception:
        pass
    return 1


def _pick_seq_tile(S: int, N: int, itemsize: int, num_tc: int = 1) -> int:
    """Sequence tile: ~4 MiB of x per grid step (near HBM roofline on v6e/v7x, amortizes
    the ~0.35us per-step overhead), multiple of 8 sublanes, no forced split on 1-TC chips."""
    row_bytes = max(N * itemsize, 1)
    ts = max((4 << 20) // row_bytes, 1)            # ~4 MiB x-block target
    # VMEM residency ~ 2*x_in + 2*out + 2*pe blocks  ->  ~<24 MiB, well under the 48 MiB limit.
    if num_tc >= 2:
        # Megacore (v7x): keep >=3 grid steps per core so each core's pipeline stays primed.
        min_steps = 3 * num_tc
        if S >= 8 * min_steps:
            ts = min(ts, max(8, ((S // min_steps) // 8) * 8))
    ts = min(ts, S)
    if ts < S:
        ts = max(8, (ts // 8) * 8)                 # 8-sublane multiple for interior blocks
        ts = min(ts, S)
    return max(ts, 1)


def positional_encoding_forward(x: jnp.ndarray, pe_full: jnp.ndarray,
                                *, donate_x: bool = False) -> jnp.ndarray:
    """x: (S, B, D).  pe_full: (max_len, D) fp32 buffer built once at init."""
    S, B, D = x.shape
    max_len, d_pe = pe_full.shape
    assert S <= max_len, "sequence length exceeds positional-encoding max_len"
    assert D == d_pe, "d_model mismatch between x and pe buffer"

    N = B * D
    x2 = x.reshape(S, N)                           # free: contiguous row-major reshape

    num_tc = _num_tensorcores()
    ts = _pick_seq_tile(S, N, jnp.dtype(x.dtype).itemsize, num_tc)

    # pe block is (ts, D): D is the full minor dim; ts is either a multiple of 8 or equals
    # the (sliced) leading dim, so the (8,128) divisibility rule always holds.
    if ts % 8 == 0 or ts == max_len:
        pe = pe_full                               # no per-call slice/cast; index_map picks rows
    else:
        pe = pe_full[:S]                           # ts == S and S % 8 != 0: tiny one-off slice

    grid = (pl.cdiv(S, ts),)                       # partial last block handled by Pallas masking
    kernel = functools.partial(_pe_add_kernel, batch=B, d_model=D)

    out2 = pl.pallas_call(
        kernel,
        out_shape=jax.ShapeDtypeStruct((S, N), x.dtype),
        grid=grid,
        in_specs=[
            pl.BlockSpec((ts, N), lambda i: (i, 0)),   # lane-dense x blocks
            pl.BlockSpec((ts, D), lambda i: (i, 0)),   # pe: 1/B of the x read traffic
        ],
        out_specs=pl.BlockSpec((ts, N), lambda i: (i, 0)),
        compiler_params=pltpu.CompilerParams(
            dimension_semantics=("parallel",),         # sequence blocks are independent
            vmem_limit_bytes=_VMEM_LIMIT_BYTES,
        ),
        # Only alias when the caller actually donates x (otherwise XLA inserts a copy).
        input_output_aliases=({0: 0} if donate_x else {}),
    )(x2, pe)
    return out2.reshape(S, B, D)


if __name__ == "__main__":
    # Small shapes consistent with the module: x = (seq_len, batch, d_model)
    S, B, D = 8, 2, 32
    key = jax.random.PRNGKey(0)
    x = jax.random.normal(key, (S, B, D), dtype=jnp.float32)

    # "Module init": build the fp32 pe buffer once.
    pe_full = make_pe_buffer(d_model=D, max_len=MAX_LEN)

    out = jax.block_until_ready(positional_encoding_forward(x, pe_full))

    # Pure-JAX reference (exact replica of the torch forward: x + pe[:S].repeat(1, B, 1)).
    ref = x + pe_full[:S][:, None, :]
    assert out.shape == x.shape
    assert jnp.allclose(out, ref, atol=1e-6), "mismatch vs reference"

    print("KERNEL_OK")
</pallas_src>

<mosaic_0001>
module attributes {stable_mosaic.version = 11 : i64} {
  func.func @_pe_add_kernel(%arg0: i32, %arg1: memref<8x64xf32, #tpu.memory_space<vmem>>, %arg2: memref<8x32xf32, #tpu.memory_space<vmem>>, %arg3: memref<8x64xf32, #tpu.memory_space<vmem>>) attributes {dimension_semantics = [#tpu.dimension_semantics<parallel>], iteration_bounds = array<i64: 1>, scalar_prefetch = 0 : i64, scratch_operands = 0 : i64, tpu.core_type = #tpu.core_type<tc>, window_params = [{transform_indices = @transform_0, window_bounds = array<i64: 8, 64>}, {transform_indices = @transform_1, window_bounds = array<i64: 8, 32>}, {transform_indices = @transform_2, window_bounds = array<i64: 8, 64>}]} {
    %c0 = arith.constant 0 : index
    %c0_0 = arith.constant 0 : index
    %0 = vector.load %arg2[%c0, %c0_0] : memref<8x32xf32, #tpu.memory_space<vmem>>, vector<8x32xf32>
    %c0_1 = arith.constant 0 : index
    %c0_2 = arith.constant 0 : index
    %1 = vector.load %arg1[%c0_1, %c0_2] : memref<8x64xf32, #tpu.memory_space<vmem>>, vector<8x32xf32>
    %2 = arith.addf %1, %0 : vector<8x32xf32>
    %c0_3 = arith.constant 0 : index
    %c0_4 = arith.constant 0 : index
    %3 = vector.load %arg3[%c0_3, %c0_4] : memref<8x64xf32, #tpu.memory_space<vmem>>, vector<8x32xf32>
    tpu.vector_store %arg3[%c0_3, %c0_4], %2 {strides = array<i32>} : memref<8x64xf32, #tpu.memory_space<vmem>>, vector<8x32xf32>,
    %c0_5 = arith.constant 0 : index
    %c32 = arith.constant 32 : index
    %4 = vector.load %arg1[%c0_5, %c32] : memref<8x64xf32, #tpu.memory_space<vmem>>, vector<8x32xf32>
    %5 = arith.addf %4, %0 : vector<8x32xf32>
    %c0_6 = arith.constant 0 : index
    %c32_7 = arith.constant 32 : index
    %6 = vector.load %arg3[%c0_6, %c32_7] : memref<8x64xf32, #tpu.memory_space<vmem>>, vector<8x32xf32>
    tpu.vector_store %arg3[%c0_6, %c32_7], %5 {strides = array<i32>} : memref<8x64xf32, #tpu.memory_space<vmem>>, vector<8x32xf32>,
    return
  }
  func.func @transform_0(%arg0: i32) -> (i32, i32) {
    %c0_i32 = arith.constant 0 : i32
    %c0_i32_0 = arith.constant 0 : i32
    return %arg0, %c0_i32 : i32, i32
  }
  func.func @transform_1(%arg0: i32) -> (i32, i32) {
    %c0_i32 = arith.constant 0 : i32
    %c0_i32_0 = arith.constant 0 : i32
    return %arg0, %c0_i32 : i32, i32
  }
  func.func @transform_2(%arg0: i32) -> (i32, i32) {
    %c0_i32 = arith.constant 0 : i32
    %c0_i32_0 = arith.constant 0 : i32
    return %arg0, %c0_i32 : i32, i32
  }
}

</mosaic_0001>

<bundles_post_ra>
// kernel: tpu_custom_call.1
= control target key start
LH: loop header
LB: loop body
LE: loop exit
PB: predicated region body
PF: predicated region fallthrough
CT: control target
= control target key end

     0   :  { %vm15_vm0 = vcmask 261120   ;;  %s100_s0 = inlined_call_operand.vmem [shape: f32[8,64], index: 0, kind: input, shape index: {}]   ;;  %s101_s1 = inlined_call_operand.vmem [shape: f32[5000,32], index: 1, kind: input, shape index: {}]   ;;  %s102_s2 = inlined_call_operand.hbm [shape: f32[8,64], index: 2, kind: output, shape index: {}]  }
   0x1   :  { %v12_v0 = vld [vmem:[%s101_s1] sm:$0xff] }
   0x2   :  { %v13_v1 = vld [vmem:[%s100_s0] sm:$0xff] }
   0x3   :  { %7 = vsyncpa [#allocation3], 0  ;;  %v14_v2 = vadd.f32 %v13_v1, %v12_v0  ;;  %s65_s13 = smov 32   ;;  %s66_s14 = smov [#allocation2]   ;;  %vm23_vm1 = vcmask 523520  }
   0x4   :  { %19 = vrot.lane.b32.xlu0 %v12_v0, %s65_s13  ;;  %s31_s15 = sshll.u32 %s66_s14, 4  ;;  %s32_s15 = int_to_ptr.vmem [resolvable:$true] %s31_s15 }
   0x5   :  { %16 = vst.msk [vmem:[#allocation2] sm:$0xff] %vm15_vm0, %v14_v2  ;;  %s41_s16 = scalar_lea.vmem %s32_s15, 128  ;;  %p46_p1 = scmp.lt.s32.totalorder %s32_s15, %s32_s15 }
   0x6   :  { %p42_p0 = scmp.ne.s32.totalorder %s32_s15, %s41_s16  ;;  %p47_p2 = scmp.lt.s32.totalorder %s41_s16, %s41_s16 }
   0x8   :  { %p48_p3 = por %p47_p2, %p46_p1 }
   0xa   :  { %p49_p4 = pnand %p48_p3, %p42_p0 }
  0x76   :  { %v20_v3 = vpop.permute.xlu0 %19 }
  0x77   :  { %v22_v4 = vadd.f32 %v20_v3, %v13_v1 }
  0x79   :  { %24 = vst.msk [vmem:[#allocation2] sm:$0xff] %vm23_vm1, %v22_v4 }
  0x7a   :  { %52 = shalt.err (!%p49_p4)
}
  0x7b   :  { %s53_s17 = scalar_lea.hbm %s102_s2, 128 }
  0x7c   :  { %p54_p5 = scmp.ne.s32.totalorder %s102_s2, %s53_s17  ;;  %p57_p6 = scmp.lt.u32.totalorder %s53_s17, %s102_s2 }
  0x7e   :  { %p59_p7 = pnand %p57_p6, %p54_p5 }
  0x80   :  { %62 = shalt.err (!%p59_p7)
}
  0x81   :  { %34 = dma.vmem_to_hbm [thread:$0]  %s32_s15, 128, %s102_s2, [#allocation3]  }
  0x82   :  { %63 = dma.done.wait [#allocation3], 128  }
  0x83   :  { %64 = vsyncadd [#allocation3], 4294967168 }
  0x84   :  { %38 = vsyncpa [#allocation3], 1 }

</bundles_post_ra>
